<compile_context>
chip_gen: v7x
topology: tpu7x:2x2x1
jax: 0.10.0
libtpu: 0.0.40
codegen_flags: <defaults>
</compile_context>

<pallas_src>
import functools

import jax
import jax.numpy as jnp
from jax import lax
from jax.experimental import pallas as pl
from jax.experimental.pallas import tpu as pltpu


def _round_up(x: int, m: int) -> int:
    return (x + m - 1) // m * m


# ----------------------------------------------------------------------------
# Fused kernel: per-frame GEMM with in-kernel temporal-tap reduction (bf16 MXU,
# f32 acc) + global-average-pool partial sums + tiny Linear head.
# ----------------------------------------------------------------------------
def _stem_head_kernel(x_ref, w_ref, hw_ref, conv_ref, logit_ref, acc_ref,
                      *, hw_valid, inv_l):
    # x_ref    : (Tp, thw, K2)   bf16  2D-unfolded patches: ALL padded frames,
    #                                  one tile of thw output spatial positions
    # w_ref    : (kT, K2, Cp)    bf16  conv weight, one (K2 x Cp) slab per temporal tap
    # hw_ref   : (Cp, Ccls)      f32   head weight (zero padded)
    # conv_ref : (T', thw, Cp)   bf16  stem activation tile (output)
    # logit_ref: (1, Ccls)       f32   per-(batch, split) partial logits (output)
    # acc_ref  : (1, Cp)         f32   pooling partial-sum scratch
    #
    # Correctness invariant: the pooling accumulator relies on the spatial-tile
    # axis (j, innermost, "arbitrary") running sequentially per (batch, split);
    # the "parallel" axes (b, s) each get their own accumulator / partial logits.
    s = pl.program_id(1)
    j = pl.program_id(2)
    n_j = pl.num_programs(2)
    k_t = w_ref.shape[0]
    t_out = conv_ref.shape[0]
    thw = conv_ref.shape[1]
    cp = conv_ref.shape[2]

    @pl.when(j == 0)
    def _init():
        acc_ref[...] = jnp.zeros_like(acc_ref)

    # Mask for the ragged tail of the HW axis (replaces a padded copy of the
    # patch tensor).  Fully-overshooting tiles (clamped index_map) mask to zero.
    col0 = (s * n_j + j) * thw
    hw_ids = col0 + lax.broadcasted_iota(jnp.int32, (thw, 1), 0)
    valid = (hw_ids < hw_valid).astype(jnp.float32)           # (thw, 1)

    def t_body(t, pool):
        # 7 temporal taps: K=147 bf16 MXU dots accumulated in f32.
        y = jnp.dot(x_ref[t], w_ref[0], preferred_element_type=jnp.float32)
        for dt in range(1, k_t):                              # static unroll
            y = y + jnp.dot(x_ref[t + dt], w_ref[dt],
                            preferred_element_type=jnp.float32)
        conv_ref[t] = y.astype(conv_ref.dtype)                # bf16 writeback, 128 lanes
        return pool + jnp.sum(y * valid, axis=0, keepdims=True)

    pool = lax.fori_loop(0, t_out, t_body, jnp.zeros((1, cp), jnp.float32))
    acc_ref[...] += pool

    @pl.when(j == n_j - 1)
    def _finalize():
        pooled = acc_ref[...] * inv_l                         # stays f32
        logit_ref[...] = jnp.dot(pooled, hw_ref[...],
                                 preferred_element_type=jnp.float32)


# ----------------------------------------------------------------------------
# Host-side glue: temporal pad + per-frame (kH,kW) unfold only (12.25x raw, not
# 86x), lane-padded weights; no padded copy / post-slice of the big tensors.
# ----------------------------------------------------------------------------
@functools.partial(jax.jit, static_argnames=("thw", "n_splits"))
def stem_and_head(video_ncthw, conv_w, head_w, head_b, *, thw=1024, n_splits=2):
    N, Cin, T, H, W = video_ncthw.shape
    Cout, _, kT, kH, kW = conv_w.shape
    ncls = head_w.shape[1]
    pad_t = kT // 2                                           # stride_T = 1, pad 3

    # ---- raw-input-sized preprocessing (cheap relative to the patch tensor) ----
    x = video_ncthw.astype(jnp.bfloat16)
    x = jnp.pad(x, ((0, 0), (0, 0), (pad_t, pad_t), (0, 0), (0, 0)))
    Tp = T + 2 * pad_t
    frames = x.transpose(0, 2, 1, 3, 4).reshape(N * Tp, Cin, H, W)

    # Per-frame spatial unfold (stride 2, pad 3).  Feature order = (Cin, kH, kW),
    # matching conv_w's layout; verified numerically in __main__.
    patches = lax.conv_general_dilated_patches(
        lhs=frames, filter_shape=(kH, kW), window_strides=(2, 2),
        padding=((kH // 2, kH // 2), (kW // 2, kW // 2)),
        dimension_numbers=("NCHW", "OIHW", "NHWC"))           # (N*Tp, H', W', Cin*kH*kW)
    Ho, Wo, K2 = patches.shape[1], patches.shape[2], patches.shape[3]
    HW = Ho * Wo
    patches = patches.reshape(N, Tp, HW, K2)                  # free (contiguous) reshape
    T_out = Tp - kT + 1                                       # == T
    L = T_out * HW

    # Lane/MXU-friendly channel padding only (Cout 64->128, classes 3->128);
    # K2 stays at its natural 147 (full-dim block), so no patch-tensor copy.
    Cp = _round_up(Cout, 128)
    Ccls = _round_up(ncls, 128)
    w_taps = conv_w.astype(jnp.bfloat16).transpose(2, 1, 3, 4, 0).reshape(kT, K2, Cout)
    w_taps = jnp.pad(w_taps, ((0, 0), (0, 0), (0, Cp - Cout)))
    hw_mat = jnp.pad(head_w.astype(jnp.float32), ((0, Cp - Cout), (0, Ccls - ncls)))

    # Spatial tiling: thw output positions per grid step.  Each step does a
    # (T' * thw)-row GEMM worth of work (~8K rows at defaults).  With thw=1024
    # the pipelined buffers are ~20 MiB -> fits v7x's 64 MiB/TC and, with the
    # raised scoped limit below, v5e's VMEM as well.
    thw_eff = min(thw, _round_up(HW, 8))
    n_tiles = pl.cdiv(HW, thw_eff)
    n_s = max(1, min(n_splits, n_tiles))      # extra parallel axis: feeds both v7x TCs even for N == 1
    n_j = pl.cdiv(n_tiles, n_s)
    HWp = n_s * n_j * thw_eff

    def x_map(b, s, j):
        # Clamp so overshooting split tiles never produce an out-of-range block;
        # their contribution is masked to zero inside the kernel.
        return (b, 0, jnp.minimum(s * n_j + j, n_tiles - 1), 0)

    conv_out, logits_p = pl.pallas_call(
        functools.partial(_stem_head_kernel, hw_valid=HW, inv_l=1.0 / L),
        out_shape=(
            jax.ShapeDtypeStruct((N, T_out, HWp, Cp), jnp.bfloat16),   # stem activation
            jax.ShapeDtypeStruct((N, n_s, 1, Ccls), jnp.float32),      # partial logits
        ),
        grid=(N, n_s, n_j),
        in_specs=[
            pl.BlockSpec((None, Tp, thw_eff, K2), x_map),
            pl.BlockSpec((kT, K2, Cp), lambda b, s, j: (0, 0, 0)),
            pl.BlockSpec((Cp, Ccls), lambda b, s, j: (0, 0)),
        ],
        out_specs=(
            pl.BlockSpec((None, T_out, thw_eff, Cp),
                         lambda b, s, j: (b, 0, s * n_j + j, 0)),
            pl.BlockSpec((None, None, 1, Ccls), lambda b, s, j: (b, s, 0, 0)),
        ),
        scratch_shapes=[pltpu.VMEM((1, Cp), jnp.float32)],
        compiler_params=pltpu.CompilerParams(
            dimension_semantics=("parallel", "parallel", "arbitrary"),
            vmem_limit_bytes=48 * 1024 * 1024,
        ),
    )(patches, w_taps, hw_mat)

    # Tiny epilogue on (N, n_s, ncls): combine split partials, add head bias.
    logits = jnp.sum(logits_p[:, :, 0, :ncls], axis=1) + head_b
    # conv_out is returned in its padded (N, T', HWp, 128) layout; the valid
    # region is [:, :, :HW, :Cout].  (Slicing here would cost an extra HBM pass.)
    return logits, conv_out


if __name__ == "__main__":
    key = jax.random.PRNGKey(0)
    k_vid, k_conv, k_hw, k_hb = jax.random.split(key, 4)

    # Small shapes consistent with the module: video NCTHW = (2, 3, 4, 16, 16)
    N, Cin, T, H, W = 2, 3, 4, 16, 16
    Cout = 64            # stem out_channels of slow_r50 blocks[0].conv
    class_num = 3        # BaseModel.init_resnet default

    video = jax.random.normal(k_vid, (N, Cin, T, H, W), dtype=jnp.float32)
    conv_w = 0.05 * jax.random.normal(k_conv, (Cout, Cin, 7, 7, 7), jnp.float32)
    head_w = 0.05 * jax.random.normal(k_hw, (Cout, class_num), jnp.float32)
    head_b = 0.01 * jax.random.normal(k_hb, (class_num,), jnp.float32)

    logits, conv_out = stem_and_head(video, conv_w, head_w, head_b)
    logits = jax.block_until_ready(logits)
    conv_out = jax.block_until_ready(conv_out)

    # -------- numerical sanity check against a plain-JAX reference ----------
    # Kernel feeds bf16 to the MXU, so build the reference from bf16-rounded
    # inputs with exact f32 accumulation.
    video_bf = video.astype(jnp.bfloat16).astype(jnp.float32)
    convw_bf = conv_w.astype(jnp.bfloat16).astype(jnp.float32)
    ref_conv = lax.conv_general_dilated(
        video_bf, convw_bf, window_strides=(1, 2, 2),
        padding=((3, 3), (3, 3), (3, 3)),
        dimension_numbers=("NCDHW", "OIDHW", "NCDHW"),
        precision=lax.Precision.HIGHEST,
    )                                                   # (N, Cout, T', H', W')
    To, Ho, Wo = ref_conv.shape[2], ref_conv.shape[3], ref_conv.shape[4]
    ref_thwc = jnp.transpose(ref_conv, (0, 2, 3, 4, 1)).reshape(N, To, Ho * Wo, Cout)
    ref_pooled = jnp.mean(ref_thwc.reshape(N, -1, Cout), axis=1)
    ref_logits = ref_pooled @ head_w + head_b

    assert logits.shape == (N, class_num)
    got_conv = conv_out[:, :, :Ho * Wo, :Cout].astype(jnp.float32)
    assert got_conv.shape == ref_thwc.shape
    assert jnp.allclose(got_conv, ref_thwc, rtol=5e-2, atol=5e-2)
    assert jnp.allclose(logits, ref_logits, rtol=2e-2, atol=1e-2)

    print("KERNEL_OK")
</pallas_src>

<mosaic_0001>
module attributes {stable_mosaic.version = 11 : i64} {
  func.func @_stem_head_kernel(%arg0: i32, %arg1: i32, %arg2: i32, %arg3: memref<1x10x64x147xbf16, #tpu.memory_space<vmem>>, %arg4: memref<7x147x128xbf16, #tpu.memory_space<vmem>>, %arg5: memref<128x128xf32, #tpu.memory_space<vmem>>, %arg6: memref<1x4x64x128xbf16, #tpu.memory_space<vmem>>, %arg7: memref<1x1x1x128xf32, #tpu.memory_space<vmem>>, %arg8: memref<1x128xf32, #tpu.memory_space<vmem>>) attributes {dimension_semantics = [#tpu.dimension_semantics<parallel>, #tpu.dimension_semantics<parallel>, #tpu.dimension_semantics<arbitrary>], iteration_bounds = array<i64: 2, 1, 1>, scalar_prefetch = 0 : i64, scratch_operands = 1 : i64, tpu.core_type = #tpu.core_type<tc>, window_params = [{transform_indices = @transform_0, window_bounds = array<i64: 1, 10, 64, 147>}, {pipeline_mode = #tpu.pipeline_mode<synchronous>, transform_indices = @transform_1, window_bounds = array<i64: 7, 147, 128>}, {pipeline_mode = #tpu.pipeline_mode<synchronous>, transform_indices = @transform_2, window_bounds = array<i64: 128, 128>}, {transform_indices = @transform_3, window_bounds = array<i64: 1, 4, 64, 128>}, {transform_indices = @transform_4, window_bounds = array<i64: 1, 1, 1, 128>}]} {
    %c0_i32 = arith.constant 0 : i32
    %0 = arith.cmpi eq, %arg2, %c0_i32 : i32
    %1 = arith.extui %0 : i1 to i32
    %c0_i32_0 = arith.constant 0 : i32
    %2 = arith.cmpi ne, %1, %c0_i32_0 : i32
    scf.if %2 {
      %cst_10 = arith.constant 0.000000e+00 : f32
      %22 = vector.broadcast %cst_10 : f32 to vector<1x128xf32>
      %c0_11 = arith.constant 0 : index
      %c0_12 = arith.constant 0 : index
      %23 = vector.load %arg8[%c0_11, %c0_12] : memref<1x128xf32, #tpu.memory_space<vmem>>, vector<1x128xf32>
      tpu.vector_store %arg8[%c0_11, %c0_12], %22 {strides = array<i32>} : memref<1x128xf32, #tpu.memory_space<vmem>>, vector<1x128xf32>,
    } else {
    }
    %c1_i32 = arith.constant 1 : i32
    %3 = arith.muli %arg1, %c1_i32 : i32
    %4 = arith.addi %3, %arg2 : i32
    %c64_i32 = arith.constant 64 : i32
    %5 = arith.muli %4, %c64_i32 : i32
    %6 = tpu.iota {dimensions = array<i32: 0>} : vector<64x1xi32>
    %7 = vector.broadcast %5 : i32 to vector<64x1xi32>
    %8 = arith.addi %7, %6 : vector<64x1xi32>
    %c64_i32_1 = arith.constant 64 : i32
    %9 = vector.broadcast %c64_i32_1 : i32 to vector<64x1xi32>
    %10 = arith.cmpi slt, %8, %9 : vector<64x1xi32>
    %11 = arith.extui %10 : vector<64x1xi1> to vector<64x1xi32>
    %12 = arith.sitofp %11 : vector<64x1xi32> to vector<64x1xf32>
    %cst = arith.constant 0.000000e+00 : f32
    %13 = vector.broadcast %cst : f32 to vector<1x128xf32>
    %c0_i32_2 = arith.constant 0 : i32
    %c4_i32 = arith.constant 4 : i32
    %14 = arith.addi %c0_i32_2, %c4_i32 : i32
    %c1_i32_3 = arith.constant 1 : i32
    %15 = scf.for %arg9 = %c0_i32_2 to %14 step %c1_i32_3 iter_args(%arg10 = %13) -> (vector<1x128xf32>)  : i32 {
      %c0_10 = arith.constant 0 : index
      %22 = arith.index_cast %arg9 : i32 to index
      %c0_11 = arith.constant 0 : index
      %c0_12 = arith.constant 0 : index
      %23 = vector.load %arg3[%c0_10, %22, %c0_11, %c0_12] : memref<1x10x64x147xbf16, #tpu.memory_space<vmem>>, vector<1x1x64x147xbf16>
      %24 = vector.shape_cast %23 : vector<1x1x64x147xbf16> to vector<64x147xbf16>
      %c0_13 = arith.constant 0 : index
      %c0_14 = arith.constant 0 : index
      %c0_15 = arith.constant 0 : index
      %25 = vector.load %arg4[%c0_13, %c0_14, %c0_15] : memref<7x147x128xbf16, #tpu.memory_space<vmem>>, vector<1x147x128xbf16>
      %26 = vector.shape_cast %25 : vector<1x147x128xbf16> to vector<147x128xbf16>
      %cst_16 = arith.constant dense<0.000000e+00> : vector<64x128xf32>
      %27 = tpu.matmul %24, %26, %cst_16 {dimension_numbers = #tpu.dot_dimension_numbers<[1], [0], [0], [1], [0, 0, 1, 1], [], []>} : vector<64x147xbf16>, vector<147x128xbf16>, vector<64x128xf32> -> vector<64x128xf32>
      %c1_i32_17 = arith.constant 1 : i32
      %28 = arith.addi %arg9, %c1_i32_17 : i32
      %c0_18 = arith.constant 0 : index
      %29 = arith.index_cast %28 : i32 to index
      %c0_19 = arith.constant 0 : index
      %c0_20 = arith.constant 0 : index
      %30 = vector.load %arg3[%c0_18, %29, %c0_19, %c0_20] : memref<1x10x64x147xbf16, #tpu.memory_space<vmem>>, vector<1x1x64x147xbf16>
      %31 = vector.shape_cast %30 : vector<1x1x64x147xbf16> to vector<64x147xbf16>
      %c1 = arith.constant 1 : index
      %c0_21 = arith.constant 0 : index
      %c0_22 = arith.constant 0 : index
      %32 = vector.load %arg4[%c1, %c0_21, %c0_22] : memref<7x147x128xbf16, #tpu.memory_space<vmem>>, vector<1x147x128xbf16>
      %33 = vector.shape_cast %32 : vector<1x147x128xbf16> to vector<147x128xbf16>
      %cst_23 = arith.constant dense<0.000000e+00> : vector<64x128xf32>
      %34 = tpu.matmul %31, %33, %cst_23 {dimension_numbers = #tpu.dot_dimension_numbers<[1], [0], [0], [1], [0, 0, 1, 1], [], []>} : vector<64x147xbf16>, vector<147x128xbf16>, vector<64x128xf32> -> vector<64x128xf32>
      %35 = arith.addf %27, %34 : vector<64x128xf32>
      %c2_i32 = arith.constant 2 : i32
      %36 = arith.addi %arg9, %c2_i32 : i32
      %c0_24 = arith.constant 0 : index
      %37 = arith.index_cast %36 : i32 to index
      %c0_25 = arith.constant 0 : index
      %c0_26 = arith.constant 0 : index
      %38 = vector.load %arg3[%c0_24, %37, %c0_25, %c0_26] : memref<1x10x64x147xbf16, #tpu.memory_space<vmem>>, vector<1x1x64x147xbf16>
      %39 = vector.shape_cast %38 : vector<1x1x64x147xbf16> to vector<64x147xbf16>
      %c2 = arith.constant 2 : index
      %c0_27 = arith.constant 0 : index
      %c0_28 = arith.constant 0 : index
      %40 = vector.load %arg4[%c2, %c0_27, %c0_28] : memref<7x147x128xbf16, #tpu.memory_space<vmem>>, vector<1x147x128xbf16>
      %41 = vector.shape_cast %40 : vector<1x147x128xbf16> to vector<147x128xbf16>
      %cst_29 = arith.constant dense<0.000000e+00> : vector<64x128xf32>
      %42 = tpu.matmul %39, %41, %cst_29 {dimension_numbers = #tpu.dot_dimension_numbers<[1], [0], [0], [1], [0, 0, 1, 1], [], []>} : vector<64x147xbf16>, vector<147x128xbf16>, vector<64x128xf32> -> vector<64x128xf32>
      %43 = arith.addf %35, %42 : vector<64x128xf32>
      %c3_i32 = arith.constant 3 : i32
      %44 = arith.addi %arg9, %c3_i32 : i32
      %c0_30 = arith.constant 0 : index
      %45 = arith.index_cast %44 : i32 to index
      %c0_31 = arith.constant 0 : index
      %c0_32 = arith.constant 0 : index
      %46 = vector.load %arg3[%c0_30, %45, %c0_31, %c0_32] : memref<1x10x64x147xbf16, #tpu.memory_space<vmem>>, vector<1x1x64x147xbf16>
      %47 = vector.shape_cast %46 : vector<1x1x64x147xbf16> to vector<64x147xbf16>
      %c3 = arith.constant 3 : index
      %c0_33 = arith.constant 0 : index
      %c0_34 = arith.constant 0 : index
      %48 = vector.load %arg4[%c3, %c0_33, %c0_34] : memref<7x147x128xbf16, #tpu.memory_space<vmem>>, vector<1x147x128xbf16>
      %49 = vector.shape_cast %48 : vector<1x147x128xbf16> to vector<147x128xbf16>
      %cst_35 = arith.constant dense<0.000000e+00> : vector<64x128xf32>
      %50 = tpu.matmul %47, %49, %cst_35 {dimension_numbers = #tpu.dot_dimension_numbers<[1], [0], [0], [1], [0, 0, 1, 1], [], []>} : vector<64x147xbf16>, vector<147x128xbf16>, vector<64x128xf32> -> vector<64x128xf32>
      %51 = arith.addf %43, %50 : vector<64x128xf32>
      %c4_i32_36 = arith.constant 4 : i32
      %52 = arith.addi %arg9, %c4_i32_36 : i32
      %c0_37 = arith.constant 0 : index
      %53 = arith.index_cast %52 : i32 to index
      %c0_38 = arith.constant 0 : index
      %c0_39 = arith.constant 0 : index
      %54 = vector.load %arg3[%c0_37, %53, %c0_38, %c0_39] : memref<1x10x64x147xbf16, #tpu.memory_space<vmem>>, vector<1x1x64x147xbf16>
      %55 = vector.shape_cast %54 : vector<1x1x64x147xbf16> to vector<64x147xbf16>
      %c4 = arith.constant 4 : index
      %c0_40 = arith.constant 0 : index
      %c0_41 = arith.constant 0 : index
      %56 = vector.load %arg4[%c4, %c0_40, %c0_41] : memref<7x147x128xbf16, #tpu.memory_space<vmem>>, vector<1x147x128xbf16>
      %57 = vector.shape_cast %56 : vector<1x147x128xbf16> to vector<147x128xbf16>
      %cst_42 = arith.constant dense<0.000000e+00> : vector<64x128xf32>
      %58 = tpu.matmul %55, %57, %cst_42 {dimension_numbers = #tpu.dot_dimension_numbers<[1], [0], [0], [1], [0, 0, 1, 1], [], []>} : vector<64x147xbf16>, vector<147x128xbf16>, vector<64x128xf32> -> vector<64x128xf32>
      %59 = arith.addf %51, %58 : vector<64x128xf32>
      %c5_i32 = arith.constant 5 : i32
      %60 = arith.addi %arg9, %c5_i32 : i32
      %c0_43 = arith.constant 0 : index
      %61 = arith.index_cast %60 : i32 to index
      %c0_44 = arith.constant 0 : index
      %c0_45 = arith.constant 0 : index
      %62 = vector.load %arg3[%c0_43, %61, %c0_44, %c0_45] : memref<1x10x64x147xbf16, #tpu.memory_space<vmem>>, vector<1x1x64x147xbf16>
      %63 = vector.shape_cast %62 : vector<1x1x64x147xbf16> to vector<64x147xbf16>
      %c5 = arith.constant 5 : index
      %c0_46 = arith.constant 0 : index
      %c0_47 = arith.constant 0 : index
      %64 = vector.load %arg4[%c5, %c0_46, %c0_47] : memref<7x147x128xbf16, #tpu.memory_space<vmem>>, vector<1x147x128xbf16>
      %65 = vector.shape_cast %64 : vector<1x147x128xbf16> to vector<147x128xbf16>
      %cst_48 = arith.constant dense<0.000000e+00> : vector<64x128xf32>
      %66 = tpu.matmul %63, %65, %cst_48 {dimension_numbers = #tpu.dot_dimension_numbers<[1], [0], [0], [1], [0, 0, 1, 1], [], []>} : vector<64x147xbf16>, vector<147x128xbf16>, vector<64x128xf32> -> vector<64x128xf32>
      %67 = arith.addf %59, %66 : vector<64x128xf32>
      %c6_i32 = arith.constant 6 : i32
      %68 = arith.addi %arg9, %c6_i32 : i32
      %c0_49 = arith.constant 0 : index
      %69 = arith.index_cast %68 : i32 to index
      %c0_50 = arith.constant 0 : index
      %c0_51 = arith.constant 0 : index
      %70 = vector.load %arg3[%c0_49, %69, %c0_50, %c0_51] : memref<1x10x64x147xbf16, #tpu.memory_space<vmem>>, vector<1x1x64x147xbf16>
      %71 = vector.shape_cast %70 : vector<1x1x64x147xbf16> to vector<64x147xbf16>
      %c6 = arith.constant 6 : index
      %c0_52 = arith.constant 0 : index
      %c0_53 = arith.constant 0 : index
      %72 = vector.load %arg4[%c6, %c0_52, %c0_53] : memref<7x147x128xbf16, #tpu.memory_space<vmem>>, vector<1x147x128xbf16>
      %73 = vector.shape_cast %72 : vector<1x147x128xbf16> to vector<147x128xbf16>
      %cst_54 = arith.constant dense<0.000000e+00> : vector<64x128xf32>
      %74 = tpu.matmul %71, %73, %cst_54 {dimension_numbers = #tpu.dot_dimension_numbers<[1], [0], [0], [1], [0, 0, 1, 1], [], []>} : vector<64x147xbf16>, vector<147x128xbf16>, vector<64x128xf32> -> vector<64x128xf32>
      %75 = arith.addf %67, %74 : vector<64x128xf32>
      %76 = arith.truncf %75 : vector<64x128xf32> to vector<64x128xbf16>
      %c0_55 = arith.constant 0 : index
      %77 = arith.index_cast %arg9 : i32 to index
      %c0_56 = arith.constant 0 : index
      %c0_57 = arith.constant 0 : index
      %78 = vector.load %arg6[%c0_55, %77, %c0_56, %c0_57] : memref<1x4x64x128xbf16, #tpu.memory_space<vmem>>, vector<1x1x64x128xbf16>
      %79 = vector.shape_cast %78 : vector<1x1x64x128xbf16> to vector<64x128xbf16>
      %80 = vector.shape_cast %76 : vector<64x128xbf16> to vector<1x1x64x128xbf16>
      tpu.vector_store %arg6[%c0_55, %77, %c0_56, %c0_57], %80 {strides = array<i32>} : memref<1x4x64x128xbf16, #tpu.memory_space<vmem>>, vector<1x1x64x128xbf16>,
      %81 = vector.broadcast %12 : vector<64x1xf32> to vector<64x128xf32>
      %82 = arith.mulf %75, %81 : vector<64x128xf32>
      %cst_58 = arith.constant dense<0.000000e+00> : vector<128xf32>
      %83 = vector.multi_reduction <add>, %82, %cst_58 [0] : vector<64x128xf32> to vector<128xf32>
      %84 = vector.shape_cast %83 : vector<128xf32> to vector<1x128xf32>
      %85 = arith.addf %arg10, %84 : vector<1x128xf32>
      scf.yield %85 : vector<1x128xf32>
    }
    %c4_i32_4 = arith.constant 4 : i32
    %c0 = arith.constant 0 : index
    %c0_5 = arith.constant 0 : index
    %16 = vector.load %arg8[%c0, %c0_5] : memref<1x128xf32, #tpu.memory_space<vmem>>, vector<1x128xf32>
    %17 = arith.addf %16, %15 : vector<1x128xf32>
    %c0_6 = arith.constant 0 : index
    %c0_7 = arith.constant 0 : index
    %18 = vector.load %arg8[%c0_6, %c0_7] : memref<1x128xf32, #tpu.memory_space<vmem>>, vector<1x128xf32>
    tpu.vector_store %arg8[%c0_6, %c0_7], %17 {strides = array<i32>} : memref<1x128xf32, #tpu.memory_space<vmem>>, vector<1x128xf32>,
    %c0_i32_8 = arith.constant 0 : i32
    %19 = arith.cmpi eq, %arg2, %c0_i32_8 : i32
    %20 = arith.extui %19 : i1 to i32
    %c0_i32_9 = arith.constant 0 : i32
    %21 = arith.cmpi ne, %20, %c0_i32_9 : i32
    scf.if %21 {
      %c0_10 = arith.constant 0 : index
      %c0_11 = arith.constant 0 : index
      %22 = vector.load %arg8[%c0_10, %c0_11] : memref<1x128xf32, #tpu.memory_space<vmem>>, vector<1x128xf32>
      %cst_12 = arith.constant 3.906250e-03 : f32
      %23 = vector.broadcast %cst_12 : f32 to vector<1x128xf32>
      %24 = arith.mulf %22, %23 : vector<1x128xf32>
      %c0_13 = arith.constant 0 : index
      %c0_14 = arith.constant 0 : index
      %25 = vector.load %arg5[%c0_13, %c0_14] : memref<128x128xf32, #tpu.memory_space<vmem>>, vector<128x128xf32>
      %cst_15 = arith.constant dense<0.000000e+00> : vector<1x128xf32>
      %26 = tpu.matmul %24, %25, %cst_15 {dimension_numbers = #tpu.dot_dimension_numbers<[1], [0], [0], [1], [0, 0, 1, 1], [], []>} : vector<1x128xf32>, vector<128x128xf32>, vector<1x128xf32> -> vector<1x128xf32>
      %c0_16 = arith.constant 0 : index
      %c0_17 = arith.constant 0 : index
      %c0_18 = arith.constant 0 : index
      %c0_19 = arith.constant 0 : index
      %27 = vector.load %arg7[%c0_16, %c0_17, %c0_18, %c0_19] : memref<1x1x1x128xf32, #tpu.memory_space<vmem>>, vector<1x1x1x128xf32>
      %28 = vector.shape_cast %27 : vector<1x1x1x128xf32> to vector<1x128xf32>
      %29 = vector.shape_cast %26 : vector<1x128xf32> to vector<1x1x1x128xf32>
      tpu.vector_store %arg7[%c0_16, %c0_17, %c0_18, %c0_19], %29 {strides = array<i32>} : memref<1x1x1x128xf32, #tpu.memory_space<vmem>>, vector<1x1x1x128xf32>,
    } else {
    }
    return
  }
  func.func @transform_0(%arg0: i32, %arg1: i32, %arg2: i32) -> (i32, i32, i32, i32) {
    %c1_i32 = arith.constant 1 : i32
    %0 = arith.muli %arg1, %c1_i32 : i32
    %1 = arith.addi %0, %arg2 : i32
    %c0_i32 = arith.constant 0 : i32
    %2 = arith.minsi %1, %c0_i32 : i32
    %c0_i32_0 = arith.constant 0 : i32
    %c0_i32_1 = arith.constant 0 : i32
    %c0_i32_2 = arith.constant 0 : i32
    return %arg0, %c0_i32_0, %2, %c0_i32_1 : i32, i32, i32, i32
  }
  func.func @transform_1(%arg0: i32, %arg1: i32, %arg2: i32) -> (i32, i32, i32) {
    %c0_i32 = arith.constant 0 : i32
    %c0_i32_0 = arith.constant 0 : i32
    %c0_i32_1 = arith.constant 0 : i32
    %c0_i32_2 = arith.constant 0 : i32
    return %c0_i32, %c0_i32_0, %c0_i32_1 : i32, i32, i32
  }
  func.func @transform_2(%arg0: i32, %arg1: i32, %arg2: i32) -> (i32, i32) {
    %c0_i32 = arith.constant 0 : i32
    %c0_i32_0 = arith.constant 0 : i32
    %c0_i32_1 = arith.constant 0 : i32
    return %c0_i32, %c0_i32_0 : i32, i32
  }
  func.func @transform_3(%arg0: i32, %arg1: i32, %arg2: i32) -> (i32, i32, i32, i32) {
    %c1_i32 = arith.constant 1 : i32
    %0 = arith.muli %arg1, %c1_i32 : i32
    %1 = arith.addi %0, %arg2 : i32
    %c0_i32 = arith.constant 0 : i32
    %c0_i32_0 = arith.constant 0 : i32
    %c0_i32_1 = arith.constant 0 : i32
    return %arg0, %c0_i32, %1, %c0_i32_0 : i32, i32, i32, i32
  }
  func.func @transform_4(%arg0: i32, %arg1: i32, %arg2: i32) -> (i32, i32, i32, i32) {
    %c0_i32 = arith.constant 0 : i32
    %c0_i32_0 = arith.constant 0 : i32
    %c0_i32_1 = arith.constant 0 : i32
    return %arg0, %arg1, %c0_i32, %c0_i32_0 : i32, i32, i32, i32
  }
}

</mosaic_0001>

<bundles_post_ra>
// kernel: stem_and_head.1
= control target key start
LH: loop header
LB: loop body
LE: loop exit
PB: predicated region body
PF: predicated region fallthrough
CT: control target
= control target key end

     0   :  { %10 = vsyncpa [#allocation4], 0  ;;  %s3657_s0 = inlined_call_operand.vmem [shape: bf16[2,10,64,147], index: 0, kind: input, shape index: {}]   ;;  %s3658_s1 = inlined_call_operand.vmem [shape: bf16[7,147,128], index: 1, kind: input, shape index: {}]   ;;  %s3659_s2 = inlined_call_operand.vmem [shape: f32[128,128], index: 2, kind: input, shape index: {}]   ;;  %s3660_s3 = inlined_call_operand.hbm [shape: bf16[2,4,64,128], index: 3, kind: output, shape index: {0}]   ;;  %s3661_s4 = inlined_call_operand.vmem [shape: f32[2,1,1,128], index: 4, kind: output, shape index: {1}]  }
   0x1   :  { %12 = vsyncpa [#allocation4 + $0x1], 0  ;;  %s3063_s15 = smov 0   ;;  %s3065_s16 = smov 0  }
   0x2   :  { %s3067_s17 = smov 0   ;;  %s3069_s18 = smov 0  }
   0x3   :  { %s3071_s19 = smov 0   ;;  %s3073_s20 = smov 0  }
   0x4 LB: > { %s2141_s21 = sadd.s32 4294967295, %s3020_s20   ;;  %s2142_s22 = sadd.s32 4294967294, %s3020_s20   ;;  %s3020_s20 = sphi %s3073_s20, %s18_s20   ;;  %s3016_s19 = sphi %s3071_s19, %s3669_s19   ;;  %s3012_s18 = sphi %s3069_s18, %s3668_s18   ;;  %s3008_s17 = sphi %s3067_s17, %s3667_s17   ;;  %s3004_s16 = sphi %s3065_s16, %s3666_s16   ;;  %s3000_s15 = sphi %s3063_s15, %s3665_s15  }
   0x5   : > { %s37_s23 = sadd.s32 1, %s3016_s19  ;;  %s124_s24 = sadd.s32 1, %s3008_s17 }
   0x6   : > { %p39_p0 = scmp.ge.s32.totalorder %s37_s23, 2  ;;  %p134_p1 = scmp.ne.s32.totalorder %s3008_s17, %s3004_s16 }
   0x7   : > { %p135_p2 = scmp.eq.s32.totalorder %s2141_s21, 1  ;;  %p140_p3 = scmp.ne.s32.totalorder %s3004_s16, %s3000_s15 }
   0x8   : > { %s3671_s23 = smov (%p39_p0, %s37_s23), 0  ;;  %p141_p5 = scmp.eq.s32.totalorder %s2142_s22, 1 }
   0x9   : > { %p3103_p4 = por %p135_p2, %p134_p1  ;;  %s119_s26 = ssub.s32 %s3016_s19, %s3671_s23 }
   0xa   : > { %p2145_p6 = scmp.ge.s32.totalorder %s3020_s20, 1  ;;  %p122_p7 = scmp.eq.s32.totalorder %s119_s26, 0 }
   0xb   : > { %p3110_p8 = por %p141_p5, %p140_p3  ;;  %p213_p9 = scmp.lt.s32.totalorder %s3020_s20, 3 }
   0xc   : > { %s3116_s28 = scalar_select %p122_p7, %s3008_s17, %s124_s24  }
   0xd   : > { %p214_p10 = pnand %p2145_p6, %p213_p9 }
   0xe   : > { %s242_s29 = sand.u32 (!%p214_p10), 1, %s3004_s16   ;;  %p257_p11 = scmp.lt.s32.totalorder (!%p214_p10), %s3012_s18, 1  ;;  %v3030_v0 = vmov (!%p214_p10), 0.0   ;;  %v3139_v1 = vmov (!%p214_p10), 0.0  }
   0xf   : > { %217 = sbr.rel (%p214_p10) target bundleno = 680 (0x2a8), region = 32  ;;  %s3122_s30 = sshll.u32 (!%p214_p10), %s242_s29, 7  ;;  %283 = vst [vmem:[#allocation2] sm:$0x1] (!%p214_p10), %v3030_v0 }
  0x10   : > { %s244_s13 = scalar_lea.vmem (!%p214_p10), [#allocation3], %s3122_s30  ;;  %s3141_s14 = smov (!%p214_p10), 0  }
  0x16   : > { %s3126_s5 = scalar_select %p257_p11, %s3012_s18, 1 }
  0x18   : > { %s2701_s6 = smul.u32 640, %s3126_s5  ;;  %s277_s9 = scalar_lea.vmem %s3661_s4, %s3126_s5 }
  0x1a   : > { %s3136_s12 = scalar_lea.vmem %s3657_s0, %s2701_s6 }
  0x1b LB: >> { %v2780_v2 = vld [vmem:[%s3658_s1 + $0x4c] sm:$0xff]   ;;  %v3031_v3 = vmov 0   ;;  %v2781_v4 = vld [vmem:[%s3658_s1 + $0xe4] sm:$0xff]   ;;  %v2782_v5 = vld [vmem:[%s3658_s1 + $0x54] sm:$0xff]   ;;  %s2487_s21 = sshll.u32 %s3028_s14, 6  ;;  %vm490_vm0 = vcmask 154624   ;;  %s3028_s14 = sphi %s3141_s14, %s333_s14   ;;  %v3024_v1 = vphi %v3139_v1, %v3664_v1  }
  0x1c   : >> { %510 = vmatprep.subr.bf16.mxu1 %v3031_v3  ;;  %1101 = vmatprep.subr.bf16.mxu0 %v3031_v3  ;;  %v2783_v6 = vld [vmem:[%s3658_s1 + $0xec] sm:$0xff]   ;;  %v2784_v7 = vld [vmem:[%s3658_s1 + $0x5c] sm:$0xff]   ;;  %v2785_v8 = vld [vmem:[%s3658_s1 + $0xf4] sm:$0xff]   ;;  %s3191_s26 = scalar_lea.vmem %s3136_s12, %s2487_s21  ;;  %vm503_vm1 = vcmask 1040384   ;;  %vm504_vm2 = vcmask 1041408   ;;  %v3032_v22 = vmov 65535  }
  0x1d   : >> { %511 = vmatpush1.bf16.msra.mxu1 %v2780_v2  ;;  %1102 = vmatpush1.bf16.msra.mxu0 %v2781_v4  ;;  %v2786_v9 = vld [vmem:[%s3658_s1 + $0x64] sm:$0xff]   ;;  %v2787_v10 = vld [vmem:[%s3658_s1 + $0xfc] sm:$0xff]   ;;  %v2788_v11 = vld [vmem:[%s3658_s1 + $0x6c] sm:$0xff]   ;;  %v505_v23 = vsel %vm503_vm1, 4294967295, %v3032_v22 }
  0x1e   : >> { %512 = vmatprep.subr.bf16.mxu1 %v3031_v3  ;;  %1103 = vmatprep.subr.bf16.mxu0 %v3031_v3  ;;  %v2789_v12 = vld [vmem:[%s3658_s1 + $0x104] sm:$0xff]   ;;  %v2790_v13 = vld [vmem:[%s3658_s1 + $0x74] sm:$0xff]   ;;  %v2791_v14 = vld [vmem:[%s3658_s1 + $0x10c] sm:$0xff]   ;;  %v3231_v26 = vsel %vm504_vm2, %v505_v23, 0 }
  0x1f   : >> { %v2802_v15 = vld [vmem:[%s3191_s26 + $0x44] ss:$8 sps:$4 sm:$0xff]   ;;  %v2792_v17 = vld [vmem:[%s3658_s1 + $0x7c] sm:$0xff]   ;;  %v2793_v18 = vld [vmem:[%s3658_s1 + $0x114] sm:$0xff]  }
  0x20   : >> { %v2805_v16 = vld [vmem:[%s3191_s26 + $0xc4] ss:$8 sps:$4 sm:$0xff]   ;;  %2196 = vmatprep.mubr.msk.bf16.mxu1 %vm490_vm0, %v2802_v15  ;;  %v2795_v20 = vld [vmem:[%s3658_s1 + $0x11c] sm:$0xff]   ;;  %v2798_v25 = vld [vmem:[%s3658_s1 + $0x94] ss:$0 sps:$4 sm:$0x33]  }
  0x21   : >> { %513 = vmatpush1.bf16.msra.mxu1 %v2782_v5  ;;  %1104 = vmatpush1.bf16.msra.mxu0 %v2783_v6  ;;  %v2794_v19 = vld [vmem:[%s3658_s1 + $0x84] sm:$0xff]   ;;  %v2796_v21 = vld [vmem:[%s3658_s1 + $0x8c] sm:$0xff]   ;;  %v508_v28 = vand.u32 %v2798_v25, %v3231_v26  ;;  %v2814_v34 = vld [vmem:[%s3191_s26 + $0x54] ss:$8 sps:$4 sm:$0xff]  }
  0x22   : >> { %514 = vmatprep.subr.bf16.mxu1 %v3031_v3  ;;  %1105 = vmatprep.subr.bf16.mxu0 %v3031_v3  ;;  %v2797_v24 = vld [vmem:[%s3658_s1 + $0x124] sm:$0xff]   ;;  %v2799_v27 = vld [vmem:[%s3658_s1 + $0x12c] ss:$0 sps:$4 sm:$0x33]   ;;  %v2807_v33 = vld [vmem:[%s3658_s1 + $0x130] sm:$0xff]  }
  0x23   : >> { %2318 = vmatprep.mubr.msk.bf16.mxu0 %vm490_vm0, %v2805_v16  ;;  %v1099_v29 = vand.u32 %v2799_v27, %v3231_v26  ;;  %v2800_v30 = vld [vmem:[%s3191_s26 + $0x40] ss:$8 sps:$4 sm:$0xff]   ;;  %v2816_v35 = vld [vmem:[%s3191_s26 + $0xd4] ss:$8 sps:$4 sm:$0xff]   ;;  %v2818_v38 = vld [vmem:[%s3191_s26 + $0x50] ss:$8 sps:$4 sm:$0xff]  }
  0x24   : >> { %v2803_v31 = vld [vmem:[%s3191_s26 + $0xc0] ss:$8 sps:$4 sm:$0xff]   ;;  %v2809_v37 = vld [vmem:[%s3658_s1 + $0x138] sm:$0xff]   ;;  %v2810_v39 = vld [vmem:[%s3658_s1 + $0x10] sm:$0xff]  }
  0x25   : >> { %515 = vmatpush1.bf16.msra.mxu1 %v2784_v7  ;;  %1106 = vmatpush1.bf16.msra.mxu0 %v2785_v8  ;;  %v2806_v32 = vld [vmem:[%s3658_s1] sm:$0xff]   ;;  %v2808_v36 = vld [vmem:[%s3658_s1 + $0x8] sm:$0xff]   ;;  %v2820_v40 = vld [vmem:[%s3191_s26 + $0xd0] ss:$8 sps:$4 sm:$0xff]  }
  0x26   : >> { %516 = vmatprep.subr.bf16.mxu1 %v3031_v3  ;;  %1107 = vmatprep.subr.bf16.mxu0 %v3031_v3  ;;  %v2811_v41 = vld [vmem:[%s3658_s1 + $0x140] sm:$0xff]   ;;  %v2812_v44 = vld [vmem:[%s3658_s1 + $0x18] sm:$0xff]   ;;  %v2813_v45 = vld [vmem:[%s3658_s1 + $0x148] sm:$0xff]  }
  0x27   : >> { %v2824_v42 = vld [vmem:[%s3191_s26 + $0x64] ss:$8 sps:$4 sm:$0xff]   ;;  %v2828_v47 = vld [vmem:[%s3191_s26 + $0x60] ss:$8 sps:$4 sm:$0xff]   ;;  %v2821_v49 = vld [vmem:[%s3658_s1 + $0x150] sm:$0xff]  }
  0x28   : >> { %v2826_v43 = vld [vmem:[%s3191_s26 + $0xe4] ss:$8 sps:$4 sm:$0xff]   ;;  %v2830_v48 = vld [vmem:[%s3191_s26 + $0xe0] ss:$8 sps:$4 sm:$0xff]   ;;  %v2834_v50 = vld [vmem:[%s3191_s26 + $0x74] ss:$8 sps:$4 sm:$0xff]  }
  0x29   : >> { %517 = vmatpush1.bf16.msra.mxu1 %v2786_v9  ;;  %1108 = vmatpush1.bf16.msra.mxu0 %v2787_v10  ;;  %v2819_v46 = vld [vmem:[%s3658_s1 + $0x20] sm:$0xff]   ;;  %v2836_v51 = vld [vmem:[%s3191_s26 + $0xf4] ss:$8 sps:$4 sm:$0xff]   ;;  %v2822_v52 = vld [vmem:[%s3658_s1 + $0x28] sm:$0xff]  }
  0x2a   : >> { %518 = vmatprep.subr.bf16.mxu1 %v3031_v3  ;;  %1109 = vmatprep.subr.bf16.mxu0 %v3031_v3  ;;  %v2823_v53 = vld [vmem:[%s3658_s1 + $0x158] sm:$0xff]   ;;  %v2829_v55 = vld [vmem:[%s3658_s1 + $0x30] sm:$0xff]   ;;  %v2831_v57 = vld [vmem:[%s3658_s1 + $0x160] sm:$0xff]  }
  0x2b   : >> { %v2838_v54 = vld [vmem:[%s3191_s26 + $0x70] ss:$8 sps:$4 sm:$0xff]   ;;  %v2846_v58 = vld [vmem:[%s3191_s26 + $0x4] ss:$8 sps:$4 sm:$0xff]   ;;  %v2844_v7 = vld [vmem:[%s3191_s26] ss:$8 sps:$4 sm:$0xff]  }
  0x2c   : >> { %v2840_v56 = vld [vmem:[%s3191_s26 + $0xf0] ss:$8 sps:$4 sm:$0xff]   ;;  %v2849_v59 = vld [vmem:[%s3191_s26 + $0x104] ss:$8 sps:$4 sm:$0xff]   ;;  %v2847_v8 = vld [vmem:[%s3191_s26 + $0x100] ss:$8 sps:$4 sm:$0xff]  }
  0x2d   : >> { %519 = vmatpush1.bf16.msra.mxu1 %v2788_v11  ;;  %1110 = vmatpush1.bf16.msra.mxu0 %v2789_v12  ;;  %v2832_v60 = vld [vmem:[%s3658_s1 + $0x38] sm:$0xff]   ;;  %v2833_v61 = vld [vmem:[%s3658_s1 + $0x168] sm:$0xff]   ;;  %v2839_v2 = vld [vmem:[%s3658_s1 + $0x40] sm:$0xff]  }
  0x2e   : >> { %520 = vmatprep.subr.bf16.mxu1 %v3031_v3  ;;  %1111 = vmatprep.subr.bf16.mxu0 %v3031_v3  ;;  %v2842_v62 = vld [vmem:[%s3658_s1 + $0x48] ss:$0 sps:$4 sm:$0x33]   ;;  %v2843_v63 = vld [vmem:[%s3658_s1 + $0x178] ss:$0 sps:$4 sm:$0x33]  }
  0x2f   : >> { %v2841_v4 = vld [vmem:[%s3658_s1 + $0x170] sm:$0xff]   ;;  %v681_v5 = vand.u32 %v2842_v62, %v3231_v26  ;;  %v1312_v6 = vand.u32 %v2843_v63, %v3231_v26  ;;  %v2850_v9 = vld [vmem:[%s3658_s1 + $0x98] sm:$0xff]   ;;  %v2854_v16 = vld [vmem:[%s3658_s1 + $0xa8] sm:$0xff]  }
  0x30   : >> { %v2851_v10 = vld [vmem:[%s3658_s1 + $0x17c] sm:$0xff]   ;;  %v2862_v15 = vld [vmem:[%s3191_s26 + $0x10] ss:$8 sps:$4 sm:$0xff]  }
  0x31   : >> { %521 = vmatpush1.bf16.msra.mxu1 %v2790_v13  ;;  %1112 = vmatpush1.bf16.msra.mxu0 %v2791_v14  ;;  %v2858_v11 = vld [vmem:[%s3191_s26 + $0x14] ss:$8 sps:$4 sm:$0xff]   ;;  %v2852_v13 = vld [vmem:[%s3658_s1 + $0xa0] sm:$0xff]  }
  0x32   : >> { %522 = vmatprep.subr.bf16.mxu1 %v3031_v3  ;;  %1113 = vmatprep.subr.bf16.mxu0 %v3031_v3  ;;  %v2860_v12 = vld [vmem:[%s3191_s26 + $0x114] ss:$8 sps:$4 sm:$0xff]   ;;  %v2853_v14 = vld [vmem:[%s3658_s1 + $0x184] sm:$0xff]  }
  0x33   : >> { %v2857_v22 = vld [vmem:[%s3658_s1 + $0x194] sm:$0xff]   ;;  %v2873_v25 = vld [vmem:[%s3191_s26 + $0x120] ss:$8 sps:$4 sm:$0xff]  }
  0x34   : >> { %v2864_v23 = vld [vmem:[%s3658_s1 + $0xb8] sm:$0xff]   ;;  %v2911_v63 = vld [vmem:[%s3658_s1 + $0x1f0] sm:$0xff]  }
  0x35   : >> { %523 = vmatpush1.bf16.msra.mxu1 %v2792_v17  ;;  %1114 = vmatpush1.bf16.msra.mxu0 %v2793_v18  ;;  %v2863_v17 = vld [vmem:[%s3191_s26 + $0x110] ss:$8 sps:$4 sm:$0xff]   ;;  %v2865_v27 = vld [vmem:[%s3658_s1 + $0x19c] sm:$0xff]  }
  0x36   : >> { %524 = vmatprep.subr.bf16.mxu1 %v3031_v3  ;;  %1115 = vmatprep.subr.bf16.mxu0 %v3031_v3  ;;  %v2855_v18 = vld [vmem:[%s3658_s1 + $0x18c] sm:$0xff]   ;;  %v2914_v62 = vld [vmem:[%s3191_s26 + $0x174] ss:$8 sps:$4 sm:$0xff]  }
  0x39   : >> { %525 = vmatpush1.bf16.msra.mxu1 %v2794_v19  ;;  %1116 = vmatpush1.bf16.msra.mxu0 %v2795_v20  ;;  %v2868_v19 = vld [vmem:[%s3191_s26 + $0x24] ss:$8 sps:$4 sm:$0xff]  }
  0x3a   : >> { %526 = vmatprep.subr.bf16.mxu1 %v3031_v3  ;;  %1117 = vmatprep.subr.bf16.mxu0 %v3031_v3  ;;  %v2870_v20 = vld [vmem:[%s3191_s26 + $0x124] ss:$8 sps:$4 sm:$0xff]  }
  0x3d   : >> { %527 = vmatpush1.bf16.msra.mxu1 %v2796_v21  ;;  %1118 = vmatpush1.bf16.msra.mxu0 %v2797_v24  ;;  %v2856_v21 = vld [vmem:[%s3658_s1 + $0xb0] sm:$0xff]   ;;  %v2872_v24 = vld [vmem:[%s3191_s26 + $0x20] ss:$8 sps:$4 sm:$0xff]  }
  0x3e   : >> { %528 = vmatprep.subr.bf16.mxu1 %v3031_v3  ;;  %1119 = vmatprep.subr.bf16.mxu0 %v3031_v3 }
  0x41   : >> { %529 = vmatpush1.bf16.msra.mxu1 %v508_v28  ;;  %1120 = vmatpush1.bf16.msra.mxu0 %v1099_v29  ;;  %v2878_v28 = vld [vmem:[%s3191_s26 + $0x34] ss:$8 sps:$4 sm:$0xff]  }
  0x42   : >> { %683 = vmatprep.subr.bf16.mxu1 %v3031_v3  ;;  %1314 = vmatprep.subr.bf16.mxu0 %v3031_v3  ;;  %v2880_v29 = vld [vmem:[%s3191_s26 + $0x134] ss:$8 sps:$4 sm:$0xff]  }
  0x44   : >> { %543 = vmatmul.mubr.bf16.vlgmr.msra.gmra.mrb[0].mxu1 %v2800_v30  ;;  %1134 = vmatmul.mubr.bf16.vlgmr.msra.gmra.mrb[0].mxu0 %v2803_v31  ;;  %v2866_v30 = vld [vmem:[%s3658_s1 + $0xc0] sm:$0xff]  }
  0x45   : >> { %684 = vmatpush1.bf16.msra.mxu1 %v2806_v32  ;;  %1315 = vmatpush1.bf16.msra.mxu0 %v2807_v33  ;;  %v2867_v31 = vld [vmem:[%s3658_s1 + $0x1a4] sm:$0xff]   ;;  %v2882_v33 = vld [vmem:[%s3191_s26 + $0x30] ss:$8 sps:$4 sm:$0xff]  }
  0x46   : >> { %685 = vmatprep.subr.bf16.mxu1 %v3031_v3  ;;  %1316 = vmatprep.subr.bf16.mxu0 %v3031_v3  ;;  %v2874_v32 = vld [vmem:[%s3658_s1 + $0xc8] sm:$0xff]  }
  0x47   : >> { %2197 = vmatprep.mubr.msk.bf16.mxu1 %vm490_vm0, %v2814_v34  ;;  %2319 = vmatprep.mubr.msk.bf16.mxu0 %vm490_vm0, %v2816_v35  ;;  %v2883_v34 = vld [vmem:[%s3191_s26 + $0x130] ss:$8 sps:$4 sm:$0xff]  }
  0x48   : >> { %v2875_v35 = vld [vmem:[%s3658_s1 + $0x1ac] sm:$0xff]  }
  0x49   : >> { %686 = vmatpush1.bf16.msra.mxu1 %v2808_v36  ;;  %1317 = vmatpush1.bf16.msra.mxu0 %v2809_v37  ;;  %v2890_v36 = vld [vmem:[%s3191_s26 + $0x84] ss:$8 sps:$4 sm:$0xff]  }
  0x4a   : >> { %687 = vmatprep.subr.bf16.mxu1 %v3031_v3  ;;  %1318 = vmatprep.subr.bf16.mxu0 %v3031_v3  ;;  %v2893_v37 = vld [vmem:[%s3191_s26 + $0x144] ss:$8 sps:$4 sm:$0xff]  }
  0x4c   : >> { %551 = vmatmul.mubr.bf16.gmra.mrb[4].mxu1 %v2818_v38  ;;  %1142 = vmatmul.mubr.bf16.gmra.mrb[4].mxu0 %v2820_v40  ;;  %v2876_v38 = vld [vmem:[%s3658_s1 + $0xd0] sm:$0xff]   ;;  %v2884_v40 = vld [vmem:[%s3658_s1 + $0xd8] sm:$0xff]  }
  0x4d   : >> { %688 = vmatpush1.bf16.msra.mxu1 %v2810_v39  ;;  %1319 = vmatpush1.bf16.msra.mxu0 %v2811_v41  ;;  %v2877_v39 = vld [vmem:[%s3658_s1 + $0x1b4] sm:$0xff]   ;;  %v2886_v41 = vld [vmem:[%s3658_s1 + $0xe0] ss:$0 sps:$4 sm:$0x33]  }
  0x4e   : >> { %689 = vmatprep.subr.bf16.mxu1 %v3031_v3  ;;  %1320 = vmatprep.subr.bf16.mxu0 %v3031_v3 }
  0x4f   : >> { %2198 = vmatprep.mubr.msk.bf16.mxu1 %vm490_vm0, %v2824_v42  ;;  %2320 = vmatprep.mubr.msk.bf16.mxu0 %vm490_vm0, %v2826_v43  ;;  %v2885_v42 = vld [vmem:[%s3658_s1 + $0x1bc] sm:$0xff]   ;;  %v2887_v43 = vld [vmem:[%s3658_s1 + $0x1c4] ss:$0 sps:$4 sm:$0x33]  }
  0x51   : >> { %690 = vmatpush1.bf16.msra.mxu1 %v2812_v44  ;;  %1321 = vmatpush1.bf16.msra.mxu0 %v2813_v45  ;;  %v886_v44 = vand.u32 %v2886_v41, %v3231_v26  ;;  %v1525_v45 = vand.u32 %v2887_v43, %v3231_v26 }
  0x52   : >> { %691 = vmatprep.subr.bf16.mxu1 %v3031_v3  ;;  %1322 = vmatprep.subr.bf16.mxu0 %v3031_v3 }
  0x54   : >> { %559 = vmatmul.mubr.bf16.gmra.mrb[8].mxu1 %v2828_v47  ;;  %1150 = vmatmul.mubr.bf16.gmra.mrb[8].mxu0 %v2830_v48  ;;  %v2891_v47 = vld [vmem:[%s3191_s26 + $0x140] ss:$8 sps:$4 sm:$0xff]  }
  0x55   : >> { %692 = vmatpush1.bf16.msra.mxu1 %v2819_v46  ;;  %1323 = vmatpush1.bf16.msra.mxu0 %v2821_v49  ;;  %v2888_v46 = vld [vmem:[%s3191_s26 + $0x80] ss:$8 sps:$4 sm:$0xff]   ;;  %v2896_v49 = vld [vmem:[%s3191_s26 + $0x94] ss:$8 sps:$4 sm:$0xff]  }
  0x56   : >> { %693 = vmatprep.subr.bf16.mxu1 %v3031_v3  ;;  %1324 = vmatprep.subr.bf16.mxu0 %v3031_v3  ;;  %v2894_v48 = vld [vmem:[%s3658_s1 + $0x1c8] sm:$0xff]  }
  0x57   : >> { %2199 = vmatprep.mubr.msk.bf16.mxu1 %vm490_vm0, %v2834_v50  ;;  %2321 = vmatprep.mubr.msk.bf16.mxu0 %vm490_vm0, %v2836_v51  ;;  %v2898_v50 = vld [vmem:[%s3191_s26 + $0x154] ss:$8 sps:$4 sm:$0xff]  }
  0x58   : >> { %v2895_v51 = vld [vmem:[%s3658_s1 + $0x1d0] sm:$0xff]  }
  0x59   : >> { %694 = vmatpush1.bf16.msra.mxu1 %v2822_v52  ;;  %1325 = vmatpush1.bf16.msra.mxu0 %v2823_v53  ;;  %v2900_v52 = vld [vmem:[%s3191_s26 + $0x90] ss:$8 sps:$4 sm:$0xff]  }
  0x5a   : >> { %695 = vmatprep.subr.bf16.mxu1 %v3031_v3  ;;  %1326 = vmatprep.subr.bf16.mxu0 %v3031_v3  ;;  %v2901_v53 = vld [vmem:[%s3191_s26 + $0x150] ss:$8 sps:$4 sm:$0xff]  }
  0x5c   : >> { %567 = vmatmul.mubr.bf16.gmra.mrb[12].mxu1 %v2838_v54  ;;  %1158 = vmatmul.mubr.bf16.gmra.mrb[12].mxu0 %v2840_v56  ;;  %v2902_v54 = vld [vmem:[%s3658_s1 + $0x1d8] sm:$0xff]   ;;  %v2906_v56 = vld [vmem:[%s3191_s26 + $0x164] ss:$8 sps:$4 sm:$0xff]  }
  0x5d   : >> { %696 = vmatpush1.bf16.msra.mxu1 %v2829_v55  ;;  %1327 = vmatpush1.bf16.msra.mxu0 %v2831_v57  ;;  %v2904_v55 = vld [vmem:[%s3191_s26 + $0xa4] ss:$8 sps:$4 sm:$0xff]  }
  0x5e   : >> { %697 = vmatprep.subr.bf16.mxu1 %v3031_v3  ;;  %1328 = vmatprep.subr.bf16.mxu0 %v3031_v3  ;;  %v2903_v57 = vld [vmem:[%s3658_s1 + $0x1e0] sm:$0xff]  }
  0x5f   : >> { %2218 = vmatprep.mubr.msk.bf16.mxu1 %vm490_vm0, %v2846_v58  ;;  %2368 = vmatprep.mubr.msk.bf16.mxu0 %vm490_vm0, %v2849_v59  ;;  %v2908_v58 = vld [vmem:[%s3191_s26 + $0xa0] ss:$8 sps:$4 sm:$0xff]  }
  0x60   : >> { %v2909_v59 = vld [vmem:[%s3191_s26 + $0x160] ss:$8 sps:$4 sm:$0xff]  }
  0x61   : >> { %698 = vmatpush1.bf16.msra.mxu1 %v2832_v60  ;;  %1329 = vmatpush1.bf16.msra.mxu0 %v2833_v61  ;;  %v2910_v60 = vld [vmem:[%s3658_s1 + $0x1e8] sm:$0xff]   ;;  %v2912_v61 = vld [vmem:[%s3191_s26 + $0xb4] ss:$8 sps:$4 sm:$0xff]  }
  0x62   : >> { %699 = vmatprep.subr.bf16.mxu1 %v3031_v3  ;;  %1330 = vmatprep.subr.bf16.mxu0 %v3031_v3 }
  0x65   : >> { %700 = vmatpush1.bf16.msra.mxu1 %v2839_v2  ;;  %1331 = vmatpush1.bf16.msra.mxu0 %v2841_v4  ;;  %v2916_v2 = vld [vmem:[%s3191_s26 + $0xb0] ss:$8 sps:$4 sm:$0xff]  }
  0x66   : >> { %701 = vmatprep.subr.bf16.mxu1 %v3031_v3  ;;  %1332 = vmatprep.subr.bf16.mxu0 %v3031_v3  ;;  %v2917_v4 = vld [vmem:[%s3191_s26 + $0x170] ss:$8 sps:$4 sm:$0xff]  }
  0x69   : >> { %702 = vmatpush1.bf16.msra.mxu1 %v681_v5  ;;  %1333 = vmatpush1.bf16.msra.mxu0 %v1312_v6  ;;  %v2918_v5 = vld [vmem:[%s3658_s1 + $0x1f8] sm:$0xff]   ;;  %v2924_v6 = vld [vmem:[%s3191_s26 + $0x184] ss:$8 sps:$4 sm:$0xff]  }
  0x6a   : >> { %888 = vmatprep.subr.bf16.mxu1 %v3031_v3  ;;  %1527 = vmatprep.subr.bf16.mxu0 %v3031_v3 }
  0x6c   : >> { %716 = vmatmul.mubr.bf16.vlgmr.msra.gmra.mrb[0].mxu1 %v2844_v7  ;;  %1347 = vmatmul.mubr.bf16.vlgmr.msra.gmra.mrb[0].mxu0 %v2847_v8  ;;  %v2927_v7 = vld [vmem:[%s3191_s26 + $0x1a4] ss:$8 sps:$4 sm:$0xff]  }
  0x6d   : >> { %889 = vmatpush1.bf16.msra.mxu1 %v2850_v9  ;;  %1528 = vmatpush1.bf16.msra.mxu0 %v2851_v10  ;;  %v2919_v8 = vld [vmem:[%s3658_s1 + $0x200] sm:$0xff]   ;;  %v2920_v9 = vld [vmem:[%s3658_s1 + $0x208] sm:$0xff]   ;;  %v2921_v10 = vld [vmem:[%s3658_s1 + $0x210] ss:$0 sps:$4 sm:$0x33]  }
  0x6e   : >> { %890 = vmatprep.subr.bf16.mxu1 %v3031_v3  ;;  %1529 = vmatprep.subr.bf16.mxu0 %v3031_v3 }
  0x6f   : >> { %2219 = vmatprep.mubr.msk.bf16.mxu1 %vm490_vm0, %v2858_v11  ;;  %2369 = vmatprep.mubr.msk.bf16.mxu0 %vm490_vm0, %v2860_v12  ;;  %v1738_v11 = vand.u32 %v2921_v10, %v3231_v26  ;;  %v2925_v12 = vld [vmem:[%s3191_s26 + $0x1a0] ss:$8 sps:$4 sm:$0xff]  }
  0x71   : >> { %891 = vmatpush1.bf16.msra.mxu1 %v2852_v13  ;;  %1530 = vmatpush1.bf16.msra.mxu0 %v2853_v14  ;;  %v2922_v13 = vld [vmem:[%s3191_s26 + $0x180] ss:$8 sps:$4 sm:$0xff]   ;;  %v2930_v14 = vld [vmem:[%s3191_s26 + $0x1b4] ss:$8 sps:$4 sm:$0xff]  }
  0x72   : >> { %892 = vmatprep.subr.bf16.mxu1 %v3031_v3  ;;  %1531 = vmatprep.subr.bf16.mxu0 %v3031_v3 }
  0x74   : >> { %724 = vmatmul.mubr.bf16.gmra.mrb[4].mxu1 %v2862_v15  ;;  %1355 = vmatmul.mubr.bf16.gmra.mrb[4].mxu0 %v2863_v17  ;;  %v2928_v15 = vld [vmem:[%s3191_s26 + $0x194] ss:$8 sps:$4 sm:$0xff]   ;;  %v2932_v17 = vld [vmem:[%s3191_s26 + $0x190] ss:$8 sps:$4 sm:$0xff]  }
  0x75   : >> { %893 = vmatpush1.bf16.msra.mxu1 %v2854_v16  ;;  %1532 = vmatpush1.bf16.msra.mxu0 %v2855_v18  ;;  %v2933_v16 = vld [vmem:[%s3191_s26 + $0x1b0] ss:$8 sps:$4 sm:$0xff]   ;;  %s2496_s26 = sshll.u32 %s3028_s14, 5  ;;  %s333_s14 = sadd.s32 1, %s3028_s14  }
  0x76   : >> { %894 = vmatprep.subr.bf16.mxu1 %v3031_v3  ;;  %1533 = vmatprep.subr.bf16.mxu0 %v3031_v3  ;;  %s1847_s6 = scalar_lea.vmem %s244_s13, %s2496_s26 [#allocation3]  ;;  %p330_p12 = scmp.ge.s32.totalorder %s333_s14, 4  }
  0x77   : >> { %2220 = vmatprep.mubr.msk.bf16.mxu1 %vm490_vm0, %v2868_v19  ;;  %2370 = vmatprep.mubr.msk.bf16.mxu0 %vm490_vm0, %v2870_v20  ;;  %vm3034_vm3 = vmmov (%p330_p12), 0   ;;  %s1996_s7 = sshll.u32 (%p330_p12), %s244_s13, 4  ;;  %s3606_s21 = scalar_lea.sflag (%p330_p12), [#allocation4], %s242_s29  ;;  %s3602_s7 = int_to_ptr.vmem [resolvable:$true] %s1996_s7 }
  0x78   : > { %s2934_s22 = scalar_lea.vmem (%p330_p12), %s3602_s7, 2048 }
  0x79   : >> { %895 = vmatpush1.bf16.msra.mxu1 %v2856_v21  ;;  %1534 = vmatpush1.bf16.msra.mxu0 %v2857_v22  ;;  %p2935_p13 = scmp.ne.s32.totalorder (%p330_p12), %s3602_s7, %s2934_s22 }
  0x7a   : >> { %896 = vmatprep.subr.bf16.mxu1 %v3031_v3  ;;  %1535 = vmatprep.subr.bf16.mxu0 %v3031_v3 }
  0x7b   : > { %p2936_p0 = pnand (%p330_p12), %p2935_p13, %p3103_p4 }
  0x7c   : >> { %732 = vmatmul.mubr.bf16.gmra.mrb[8].mxu1 %v2872_v24  ;;  %1363 = vmatmul.mubr.bf16.gmra.mrb[8].mxu0 %v2873_v25 }
  0x7d   : >> { %897 = vmatpush1.bf16.msra.mxu1 %v2864_v23  ;;  %1536 = vmatpush1.bf16.msra.mxu0 %v2865_v27  ;;  %p2937_p1 = pneg (%p330_p12), %p2936_p0 }
  0x7e   : >> { %898 = vmatprep.subr.bf16.mxu1 %v3031_v3  ;;  %1537 = vmatprep.subr.bf16.mxu0 %v3031_v3 }
  0x7f   : >> { %2221 = vmatprep.mubr.msk.bf16.mxu1 %vm490_vm0, %v2878_v28  ;;  %2371 = vmatprep.mubr.msk.bf16.mxu0 %vm490_vm0, %v2880_v29 }
  0x81   : >> { %899 = vmatpush1.bf16.msra.mxu1 %v2866_v30  ;;  %1538 = vmatpush1.bf16.msra.mxu0 %v2867_v31 }
  0x82   : >> { %900 = vmatprep.subr.bf16.mxu1 %v3031_v3  ;;  %1539 = vmatprep.subr.bf16.mxu0 %v3031_v3 }
  0x84   : >> { %740 = vmatmul.mubr.bf16.gmra.mrb[12].mxu1 %v2882_v33  ;;  %1371 = vmatmul.mubr.bf16.gmra.mrb[12].mxu0 %v2883_v34 }
  0x85   : >> { %901 = vmatpush1.bf16.msra.mxu1 %v2874_v32  ;;  %1540 = vmatpush1.bf16.msra.mxu0 %v2875_v35 }
  0x86   : >> { %902 = vmatprep.subr.bf16.mxu1 %v3031_v3  ;;  %1541 = vmatprep.subr.bf16.mxu0 %v3031_v3 }
  0x87   : >> { %2268 = vmatprep.mubr.msk.bf16.mxu1 %vm490_vm0, %v2890_v36  ;;  %2418 = vmatprep.mubr.msk.bf16.mxu0 %vm490_vm0, %v2893_v37 }
  0x89   : >> { %903 = vmatpush1.bf16.msra.mxu1 %v2876_v38  ;;  %1542 = vmatpush1.bf16.msra.mxu0 %v2877_v39 }
  0x8a   : >> { %904 = vmatprep.subr.bf16.mxu1 %v3031_v3  ;;  %1543 = vmatprep.subr.bf16.mxu0 %v3031_v3 }
  0x8d   : >> { %905 = vmatpush1.bf16.msra.mxu1 %v2884_v40  ;;  %1544 = vmatpush1.bf16.msra.mxu0 %v2885_v42 }
  0x8e   : >> { %906 = vmatprep.subr.bf16.mxu1 %v3031_v3  ;;  %1545 = vmatprep.subr.bf16.mxu0 %v3031_v3 }
  0x91   : >> { %907 = vmatpush1.bf16.msra.mxu1 %v886_v44  ;;  %1546 = vmatpush1.bf16.msra.mxu0 %v1525_v45 }
  0x92   : >> { %2597 = vmatprep.subr.bf16.mxu1 %v3031_v3  ;;  %1740 = vmatprep.subr.bf16.mxu0 %v3031_v3 }
  0x94   : >> { %921 = vmatmul.mubr.bf16.vlgmr.msra.gmra.mrb[0].mxu1 %v2888_v46  ;;  %1560 = vmatmul.mubr.bf16.vlgmr.msra.gmra.mrb[0].mxu0 %v2891_v47 }
  0x95   : >> { %2607 = vmatpush1.bf16.msra.mxu1 %v2894_v48  ;;  %1741 = vmatpush1.bf16.msra.mxu0 %v2894_v48 }
  0x96   : >> { %2598 = vmatprep.subr.bf16.mxu1 %v3031_v3  ;;  %1742 = vmatprep.subr.bf16.mxu0 %v3031_v3 }
  0x97   : >> { %2269 = vmatprep.mubr.msk.bf16.mxu1 %vm490_vm0, %v2896_v49  ;;  %2419 = vmatprep.mubr.msk.bf16.mxu0 %vm490_vm0, %v2898_v50 }
  0x99   : >> { %2608 = vmatpush1.bf16.msra.mxu1 %v2895_v51  ;;  %1743 = vmatpush1.bf16.msra.mxu0 %v2895_v51 }
  0x9a   : >> { %2599 = vmatprep.subr.bf16.mxu1 %v3031_v3  ;;  %1744 = vmatprep.subr.bf16.mxu0 %v3031_v3 }
  0x9c   : >> { %929 = vmatmul.mubr.bf16.gmra.mrb[4].mxu1 %v2900_v52  ;;  %1568 = vmatmul.mubr.bf16.gmra.mrb[4].mxu0 %v2901_v53 }
  0x9d   : >> { %2609 = vmatpush1.bf16.msra.mxu1 %v2902_v54  ;;  %1745 = vmatpush1.bf16.msra.mxu0 %v2902_v54 }
  0x9e   : >> { %2600 = vmatprep.subr.bf16.mxu1 %v3031_v3  ;;  %1746 = vmatprep.subr.bf16.mxu0 %v3031_v3 }
  0x9f   : >> { %2270 = vmatprep.mubr.msk.bf16.mxu1 %vm490_vm0, %v2904_v55  ;;  %2420 = vmatprep.mubr.msk.bf16.mxu0 %vm490_vm0, %v2906_v56 }
  0xa1   : >> { %2610 = vmatpush1.bf16.msra.mxu1 %v2903_v57  ;;  %1747 = vmatpush1.bf16.msra.mxu0 %v2903_v57 }
  0xa2   : >> { %2601 = vmatprep.subr.bf16.mxu1 %v3031_v3  ;;  %1748 = vmatprep.subr.bf16.mxu0 %v3031_v3 }
  0xa4   : >> { %937 = vmatmul.mubr.bf16.gmra.mrb[8].mxu1 %v2908_v58  ;;  %1576 = vmatmul.mubr.bf16.gmra.mrb[8].mxu0 %v2909_v59 }
  0xa5   : >> { %2611 = vmatpush1.bf16.msra.mxu1 %v2910_v60  ;;  %1749 = vmatpush1.bf16.msra.mxu0 %v2910_v60 }
  0xa6   : >> { %2602 = vmatprep.subr.bf16.mxu1 %v3031_v3  ;;  %1750 = vmatprep.subr.bf16.mxu0 %v3031_v3 }
  0xa7   : >> { %2271 = vmatprep.mubr.msk.bf16.mxu1 %vm490_vm0, %v2912_v61  ;;  %2421 = vmatprep.mubr.msk.bf16.mxu0 %vm490_vm0, %v2914_v62 }
  0xa9   : >> { %2612 = vmatpush1.bf16.msra.mxu1 %v2911_v63  ;;  %1751 = vmatpush1.bf16.msra.mxu0 %v2911_v63 }
  0xaa   : >> { %2603 = vmatprep.subr.bf16.mxu1 %v3031_v3  ;;  %1752 = vmatprep.subr.bf16.mxu0 %v3031_v3 }
  0xac   : >> { %945 = vmatmul.mubr.bf16.gmra.mrb[12].mxu1 %v2916_v2  ;;  %1584 = vmatmul.mubr.bf16.gmra.mrb[12].mxu0 %v2917_v4 }
  0xad   : >> { %2613 = vmatpush1.bf16.msra.mxu1 %v2918_v5  ;;  %1753 = vmatpush1.bf16.msra.mxu0 %v2918_v5 }
  0xae   : >> { %2604 = vmatprep.subr.bf16.mxu1 %v3031_v3  ;;  %1754 = vmatprep.subr.bf16.mxu0 %v3031_v3 }
  0xaf   : >> { %2468 = vmatprep.mubr.msk.bf16.mxu0 %vm490_vm0, %v2924_v6  ;;  %2470 = vmatprep.mubr.msk.bf16.mxu1 %vm490_vm0, %v2927_v7 }
  0xb1   : >> { %2614 = vmatpush1.bf16.msra.mxu1 %v2919_v8  ;;  %1755 = vmatpush1.bf16.msra.mxu0 %v2919_v8 }
  0xb2   : >> { %2605 = vmatprep.subr.bf16.mxu1 %v3031_v3  ;;  %1756 = vmatprep.subr.bf16.mxu0 %v3031_v3 }
  0xb5   : >> { %2615 = vmatpush1.bf16.msra.mxu1 %v2920_v9  ;;  %1757 = vmatpush1.bf16.msra.mxu0 %v2920_v9 }
  0xb6   : >> { %2606 = vmatprep.subr.bf16.mxu1 %v3031_v3  ;;  %1758 = vmatprep.subr.bf16.mxu0 %v3031_v3 }
  0xb9   : >> { %2616 = vmatpush1.bf16.msra.mxu1 %v1738_v11  ;;  %1759 = vmatpush1.bf16.msra.mxu0 %v1738_v11 }
  0xbc   : >> { %1789 = vmatmul.mubr.bf16.vlgmr.msra.gmra.mrb[16].mxu1 %v2925_v12  ;;  %1773 = vmatmul.mubr.bf16.vlgmr.msra.gmra.mrb[0].mxu0 %v2922_v13 }
  0xbd   : >> { %2471 = vmatprep.mubr.msk.bf16.mxu1 %vm490_vm0, %v2930_v14  ;;  %2469 = vmatprep.mubr.msk.bf16.mxu0 %vm490_vm0, %v2928_v15 }
  0xc4   : >> { %1797 = vmatmul.mubr.bf16.gmra.mrb[20].mxu1 %v2933_v16  ;;  %1781 = vmatmul.mubr.bf16.gmra.mrb[4].mxu0 %v2932_v17 }
  0xc5   : > { %2570 = vmatprep.mubr.msk.f32.mxu0 (%p330_p12), %vm3034_vm3, %v3030_v0  ;;  %v1892_v0 = vld [vmem:[%s3659_s2 + $0x30] sm:$0xff] (%p330_p12) }
 0x167   : >> { %v922_v26 = vpop.f32.mrb[0].mxu1 }
 0x168   : >> { %v924_v18 = vpop.f32.mrb[1].mxu1 }
 0x169   : >> { %v925_v19 = vpop.f32.mrb[2].mxu1 }
 0x16a   : >> { %v927_v3 = vpop.f32.mrb[3].mxu1 }
 0x16f   : >> { %v930_v20 = vpop.f32.mrb[4].mxu1 }
 0x170   : >> { %v932_v21 = vpop.f32.mrb[5].mxu1 }
 0x171   : >> { %v933_v22 = vpop.f32.mrb[6].mxu1 }
 0x172   : >> { %v935_v23 = vpop.f32.mrb[7].mxu1 }
 0x177   : >> { %v938_v24 = vpop.f32.mrb[8].mxu1  ;;  %v1577_v25 = vpop.f32.mrb[8].mxu0 }
 0x178   : >> { %v940_v27 = vpop.f32.mrb[9].mxu1  ;;  %v2621_v28 = vadd.f32 %v1577_v25, %v938_v24  ;;  %v1579_v29 = vpop.f32.mrb[9].mxu0  ;;  %v1887_v25 = vld [vmem:[%s3659_s2 + $0x8] sm:$0xff] (%p330_p12) }
 0x179   : >> { %v941_v30 = vpop.f32.mrb[10].mxu1  ;;  %v1580_v31 = vpop.f32.mrb[10].mxu0  ;;  %v3033_v27 = vmov (%p330_p12), 0.0|0.0   ;;  %v1889_v29 = vld [vmem:[%s3659_s2 + $0x18] sm:$0xff] (%p330_p12) }
 0x17a   : >> { %v943_v32 = vpop.f32.mrb[11].mxu1  ;;  %v2623_v33 = vadd.f32 %v1580_v31, %v941_v30  ;;  %v1582_v34 = vpop.f32.mrb[11].mxu0  ;;  %2573 = vmatprep.subr.bf16.mxu0 (%p330_p12), %v3033_v27  ;;  %v1890_v31 = vld [vmem:[%s3659_s2 + $0x20] sm:$0xff] (%p330_p12) }
 0x17b   : > { %v1891_v32 = vld [vmem:[%s3659_s2 + $0x28] sm:$0xff] (%p330_p12) }
 0x17f   : >> { %v946_v35 = vpop.f32.mrb[12].mxu1  ;;  %v1585_v36 = vpop.f32.mrb[12].mxu0 }
 0x180   : >> { %v948_v37 = vpop.f32.mrb[13].mxu1  ;;  %v2625_v38 = vadd.f32 %v1585_v36, %v946_v35  ;;  %v1587_v39 = vpop.f32.mrb[13].mxu0  ;;  %v2580_v35 = vpack.c.bf16 (%p330_p12), %v1891_v32, %v1890_v31  ;;  %v1893_v36 = vld [vmem:[%s3659_s2 + $0x38] sm:$0xff] (%p330_p12) }
 0x181   : >> { %v949_v40 = vpop.f32.mrb[14].mxu1  ;;  %v1588_v41 = vpop.f32.mrb[14].mxu0  ;;  %v2583_v37 = vpack.c.bf16 (%p330_p12), %v1893_v36, %v1892_v0  ;;  %v1895_v39 = vld [vmem:[%s3659_s2 + $0x48] sm:$0xff] (%p330_p12) }
 0x182   : >> { %v951_v42 = vpop.f32.mrb[15].mxu1  ;;  %v2627_v43 = vadd.f32 %v1588_v41, %v949_v40  ;;  %v1590_v44 = vpop.f32.mrb[15].mxu0  ;;  %v1896_v41 = vld [vmem:[%s3659_s2 + $0x50] sm:$0xff] (%p330_p12) }
 0x183   : > { %v1897_v42 = vld [vmem:[%s3659_s2 + $0x58] sm:$0xff] (%p330_p12)  ;;  %v1898_v44 = vld [vmem:[%s3659_s2 + $0x60] sm:$0xff] (%p330_p12) }
 0x18f   : >> { %v1790_v45 = vpop.f32.mrb[16].mxu1  ;;  %v1774_v46 = vpop.f32.mrb[0].mxu0 }
 0x190   : >> { %v2622_v47 = vadd.f32 %v2621_v28, %v1790_v45  ;;  %v1792_v48 = vpop.f32.mrb[17].mxu1  ;;  %v2617_v49 = vadd.f32 %v1774_v46, %v922_v26  ;;  %v1776_v50 = vpop.f32.mrb[1].mxu0  ;;  %v1899_v45 = vld [vmem:[%s3659_s2 + $0x68] sm:$0xff] (%p330_p12) }
 0x191   : >> { %v1793_v51 = vpop.f32.mrb[18].mxu1  ;;  %v1777_v52 = vpop.f32.mrb[2].mxu0  ;;  %v2592_v46 = vpack.c.bf16 (%p330_p12), %v1899_v45, %v1898_v44  ;;  %v1901_v48 = vld [vmem:[%s3659_s2 + $0x78] sm:$0xff] (%p330_p12) }
 0x192   : >> { %v2624_v53 = vadd.f32 %v2623_v33, %v1793_v51  ;;  %v1795_v54 = vpop.f32.mrb[19].mxu1  ;;  %v2618_v55 = vadd.f32 %v1777_v52, %v925_v19  ;;  %v1779_v56 = vpop.f32.mrb[3].mxu0  ;;  %v1878_v33 = vld [vmem:[#allocation2] sm:$0x1] (%p330_p12) }
 0x194   : >> { %v2511_v57 = vpack.c.bf16 %v2624_v53, %v2622_v47  ;;  %v2501_v58 = vpack.c.bf16 %v2618_v55, %v2617_v49  ;;  %v1864_v59 = vadd.f32 %v2618_v55, %v2617_v49 }
 0x196   : >> { %2519 = vst [vmem:[%s1847_s6 + $0x10] sm:$0xff] %v2511_v57   ;;  %2502 = vst [vmem:[%s1847_s6] sm:$0xff] %v2501_v58  }
 0x197   : >> { %v1798_v60 = vpop.f32.mrb[20].mxu1  ;;  %v1782_v61 = vpop.f32.mrb[4].mxu0 }
 0x198   : >> { %v2626_v62 = vadd.f32 %v2625_v38, %v1798_v60  ;;  %v1800_v63 = vpop.f32.mrb[21].mxu1  ;;  %v2619_v2 = vadd.f32 %v1782_v61, %v930_v20  ;;  %v1784_v4 = vpop.f32.mrb[5].mxu0  ;;  %v1894_v38 = vld [vmem:[%s3659_s2 + $0x40] sm:$0xff] (%p330_p12) }
 0x199   : >> { %v1801_v5 = vpop.f32.mrb[22].mxu1  ;;  %v1785_v6 = vpop.f32.mrb[6].mxu0  ;;  %v2586_v40 = vpack.c.bf16 (%p330_p12), %v1895_v39, %v1894_v38 }
 0x19a   : >> { %v2628_v7 = vadd.f32 %v2627_v43, %v1801_v5  ;;  %v1803_v8 = vpop.f32.mrb[23].mxu1  ;;  %v1865_v9 = vadd.f32 %v2619_v2, %v1864_v59  ;;  %v2620_v10 = vadd.f32 %v1785_v6, %v933_v22  ;;  %v1787_v11 = vpop.f32.mrb[7].mxu0  ;;  %v1886_v22 = vld [vmem:[%s3659_s2] sm:$0xff] (%p330_p12)  ;;  %v2589_v43 = vpack.c.bf16 (%p330_p12), %v1897_v42, %v1896_v41 }
 0x19b   : > { %v2574_v28 = vpack.c.bf16 (%p330_p12), %v1887_v25, %v1886_v22 }
 0x19c   : >> { %v2516_v12 = vpack.c.bf16 %v2628_v7, %v2626_v62  ;;  %v2506_v13 = vpack.c.bf16 %v2620_v10, %v2619_v2  ;;  %v1866_v14 = vadd.f32 %v2620_v10, %v1865_v9 }
 0x19d   : > { %2575 = vmatpush3.bf16.msra.mxu0 (%p330_p12), %v2574_v28 }
 0x19e   : >> { %2520 = vst [vmem:[%s1847_s6 + $0x18] sm:$0xff] %v2516_v12   ;;  %2518 = vst [vmem:[%s1847_s6 + $0x8] sm:$0xff] %v2506_v13   ;;  %v1867_v15 = vadd.f32 %v2622_v47, %v1866_v14  ;;  %2576 = vmatprep.subr.bf16.mxu0 (%p330_p12), %v3033_v27  ;;  %v1900_v47 = vld [vmem:[%s3659_s2 + $0x70] sm:$0xff] (%p330_p12)  ;;  %s2497_s6 = sshll.u32 (%p330_p12), %s3012_s18, 11  ;;  %s3035_s18 = smov (%p330_p12), [#allocation3]  }
 0x19f   : > { %v2595_v49 = vpack.c.bf16 (%p330_p12), %v1901_v48, %v1900_v47  ;;  %s3600_s11 = scalar_lea.hbm (%p330_p12), %s3660_s3, %s2497_s6  ;;  %s2938_s30 = sshll.u32 (%p330_p12), %s3035_s18, 4  ;;  %s2939_s30 = int_to_ptr.vmem [resolvable:$false] %s2938_s30 }
 0x1a0   : >> { %v1868_v16 = vadd.f32 %v2624_v53, %v1867_v15  ;;  %s2940_s13 = scalar_lea.vmem (%p330_p12), %s2939_s30, 4096  ;;  %p2941_p2 = scmp.lt.s32.totalorder (%p330_p12), %s3602_s7, %s2939_s30 }
 0x1a1   : > { %p2942_p3 = scmp.lt.s32.totalorder (%p330_p12), %s2940_s13, %s2934_s22 }
 0x1a2   : >> { %v1869_v17 = vadd.f32 %v2626_v62, %v1868_v16 }
 0x1a3   : > { %p2943_p5 = por (%p330_p12), %p2942_p3, %p2941_p2 }
 0x1a4   : >> { %v1870_v26 = vadd.f32 %v2628_v7, %v1869_v17 }
 0x1a5   : > { %p2944_p6 = pnand (%p330_p12), %p2943_p5, %p2937_p1 }
 0x1a6   : >> { %v1871_v18 = vrot.slane %v1870_v26, 4 }
 0x1a8   : >> { %v1872_v19 = vadd.f32 %v1871_v18, %v1870_v26 }
 0x1aa   : >> { %v1873_v3 = vrot.slane %v1872_v19, 2 }
 0x1ac   : >> { %v1874_v20 = vadd.f32 %v1873_v3, %v1872_v19 }
 0x1ae   : >> { %v1875_v21 = vrot.slane %v1874_v20, 1  ;;  %332 = sbr.rel (!%p330_p12) target bundleno = 27 (0x1b), region = 108 }
 0x1b0   : >> { %v1876_v23 = vadd.f32 %v1875_v21, %v1874_v20 }
 0x1b2   : >> { %v1877_v24 = vadd.f32 %v3024_v1, %v1876_v23  }
 0x1b4   : >> { %v3664_v1 = vmov %v1877_v24  ;;  %v1879_v34 = vadd.f32 (%p330_p12), %v1878_v33, %v1877_v24 }
 0x1b5   : > { %v1888_v1 = vld [vmem:[%s3659_s2 + $0x10] sm:$0xff] }
 0x1b6   : > { %v2577_v30 = vpack.c.bf16 %v1889_v29, %v1888_v1  ;;  %1880 = vst [vmem:[#allocation2] sm:$0x1] %v1879_v34 }
 0x1b8   : > { %2578 = vmatpush3.bf16.msra.mxu0 %v2577_v30 }
 0x1b9   : > { %2579 = vmatprep.subr.bf16.mxu0 %v3033_v27 }
 0x1bc   : > { %2581 = vmatpush3.bf16.msra.mxu0 %v2580_v35 }
 0x1bd   : > { %2582 = vmatprep.subr.bf16.mxu0 %v3033_v27  ;;  %v1884_v50 = vld [vmem:[#allocation2] sm:$0x1] }
 0x1be   : > { %v1885_v51 = vmul.f32 0.00390625, %v1884_v50 }
 0x1c0   : > { %2584 = vmatpush3.bf16.msra.mxu0 %v2583_v37 }
 0x1c1   : > { %2585 = vmatprep.subr.bf16.mxu0 %v3033_v27 }
 0x1c4   : > { %2587 = vmatpush3.bf16.msra.mxu0 %v2586_v40 }
 0x1c5   : > { %2588 = vmatprep.subr.bf16.mxu0 %v3033_v27 }
 0x1c8   : > { %2590 = vmatpush3.bf16.msra.mxu0 %v2589_v43 }
 0x1c9   : > { %2591 = vmatprep.subr.bf16.mxu0 %v3033_v27 }
 0x1cc   : > { %2593 = vmatpush3.bf16.msra.mxu0 %v2592_v46 }
 0x1cd   : > { %2594 = vmatprep.subr.bf16.mxu0 %v3033_v27 }
 0x1d0   : > { %2596 = vmatpush3.bf16.msra.mxu0 %v2595_v49 }
 0x1d3   : > { %2571 = vmatmul.mubr.f32.vlgmr.msra.gmra.mrb[0].mxu0 %v1885_v51 }
 0x1d4   : > { %2947 = shalt.err (!%p2944_p6)
}
 0x1d5   : > { %s2948_s29 = scalar_lea.hbm %s3600_s11, 2048  ;;  %s2952_s12 = scalar_lea.hbm %s3660_s3, 4096 }
 0x1d6   : > { %p2949_p7 = scmp.ne.s32.totalorder %s3600_s11, %s2948_s29  ;;  %p2953_p11 = scmp.lt.u32.totalorder %s3600_s11, %s3660_s3 }
 0x1d7   : > { %p2954_p12 = scmp.lt.u32.totalorder %s2952_s12, %s2948_s29  ;;  %p2956_p0 = scmp.lt.u32.totalorder %s2948_s29, %s3600_s11 }
 0x1d8   : > { %p2950_p9 = pnand %p2949_p7, %p3103_p4 }
 0x1d9   : > { %p2955_p13 = por %p2954_p12, %p2953_p11 }
 0x1da   : > { %p2951_p10 = pneg %p2950_p9 }
 0x1db   : > { %p2957_p1 = por %p2956_p0, %p2955_p13 }
 0x1dd   : > { %p2958_p2 = pnand %p2957_p1, %p2951_p10 }
 0x1df   : > { %2961 = shalt.err (!%p2958_p2)
}
 0x1e0   : > { %s3036_s8 = smov 64   ;;  %s3037_s10 = smov 4  }
 0x1e1   : > { %2702 = dma.vmem_to_hbm [thread:$0]  (%p3103_p4), %s3602_s7, 2048, %s3600_s11, %s3606_s21, %s3036_s8, %s3036_s8, %s3037_s10  }
 0x2a6   : > { %v1968_v52 = vpop.f32.mrb[0].mxu0 }
 0x2a7   : > { %1972 = vst [vmem:[%s277_s9] sm:$0x1] %v1968_v52  ;;  %v2572_v53 = vpop.f32.mrb[1].mxu0 }
 0x2a8 PF: > { %p2708_p3 = scmp.ge.s32.totalorder %s3020_s20, 2  ;;  %s2014_s30 = sand.u32 1, %s3000_s15  }
 0x2a9   : > { %s2015_s13 = scalar_lea.sflag [#allocation4], %s2014_s30 }
 0x2aa   : > { %p2705_p5 = pnand %p2708_p3, %p3110_p8 }
 0x2ac   : > { %2995 = dma.done.wait (!%p2705_p5), %s2015_s13, 2048  }
 0x2ad   : > { %2997 = vsyncadd (!%p2705_p5), %s2015_s13, 4294965248  ;;  %s18_s20 = sadd.s32 1, %s3020_s20   ;;  %s3665_s15 = smov %s3004_s16 }
 0x2ae   : > { %p15_p4 = scmp.ge.s32.totalorder %s18_s20, 4   ;;  %s3666_s16 = smov %s3008_s17 }
 0x2af   : > { %s3667_s17 = smov %s3116_s28  ;;  %s3668_s18 = smov %s3016_s19 }
 0x2b0   : > { %s3669_s19 = smov %s3671_s23  ;;  %17 = sbr.rel (!%p15_p4) target bundleno = 4 (0x4), region = 119 }
 0x2b7   :  { %2029 = vsyncpa [#allocation4], 1 }
 0x2b8   :  { %2031 = vsyncpa [#allocation4 + $0x1], 1 }

</bundles_post_ra>
